<compile_context>
chip_gen: v7x
topology: tpu7x:2x2x1
jax: 0.10.0
libtpu: 0.0.40
codegen_flags: <defaults>
</compile_context>

<pallas_src>
import functools

import jax
import jax.numpy as jnp
from jax import lax
from jax.experimental import pallas as pl
from jax.experimental.pallas import tpu as pltpu


_LANE = 128
_TM_MAX = 512                       # gram row/col tile cap (multiple of 128)
_VMEM_BUDGET = 40 * 1024 * 1024     # tile planning budget (leaves headroom)
_VMEM_LIMIT = 48 * 1024 * 1024      # scoped-VMEM request (< v7x 64 MiB physical)
_FEED_DTYPE = jnp.bfloat16          # MXU feed dtype; accumulation stays f32


def _round_up(x, m):
    return (x + m - 1) // m * m


def _tile_plan(m, k, in_bytes):
    """Pick (tm, tk, mp, kp): tile sizes and zero-padded array extents."""
    # Lane-dense M padding (multiple of 128): gram/acc/target tiles are unmasked.
    mp = _round_up(m, _LANE)
    nt = -(-mp // _TM_MAX)                       # number of M tiles
    tm = _round_up(-(-mp // nt), _LANE)
    mp = tm * nt

    kp = _round_up(k, _LANE)
    # Largest contraction tile that fits the VMEM budget.  Prefer kt == 1: the
    # lhs strip then stays resident across a whole row of tile pairs.
    fixed = 3 * tm * tm * 4                      # f32 acc + double-buffered (tm,tm) tile
    per_k = 4 * tm * in_bytes                    # lhs + rhs tiles, double buffered
    tk_cap = max((_VMEM_BUDGET - fixed) // per_k, _LANE)
    tk_cap = max(tk_cap // _LANE * _LANE, _LANE)
    if kp <= tk_cap:
        tk = kp
    else:
        kt = -(-kp // tk_cap)                    # number of K tiles
        tk = _round_up(-(-kp // kt), _LANE)
        kp = tk * kt
    return tm, tk, mp, kp


# ----------------------------- kernels --------------------------------------


def _gram_kernel(lhs_ref, rhs_ref, g_ref, acc_ref, *, inv_denom):
    """One (tm, tm) tile of G = (F @ F.T) * inv_denom, accumulated over k tiles."""
    kk = pl.program_id(2)

    @pl.when(kk == 0)
    def _zero():
        acc_ref[...] = jnp.zeros_like(acc_ref)

    # lhs (tm, tk) @ rhs (tk, tm): rhs comes from the pre-transposed feats.T,
    # so this is a plain MXU matmul with f32 accumulation.
    acc_ref[...] += jnp.dot(lhs_ref[...], rhs_ref[...],
                            preferred_element_type=jnp.float32)

    @pl.when(kk == pl.num_programs(2) - 1)
    def _finalize():
        g_ref[...] = (acc_ref[...] * inv_denom).astype(g_ref.dtype)


def _style_loss_kernel(ti_ref, tj_ref, wt_ref, lhs_ref, rhs_ref, tgt_ref,
                       part_ref, acc_ref, *, inv_denom, inv_numel):
    """Upper-triangular tile pair p: weighted squared-diff partial sum vs target."""
    p = pl.program_id(0)
    kk = pl.program_id(1)
    nk = pl.num_programs(1)

    @pl.when(kk == 0)
    def _zero_acc():
        acc_ref[...] = jnp.zeros_like(acc_ref)

    acc_ref[...] += jnp.dot(lhs_ref[...], rhs_ref[...],
                            preferred_element_type=jnp.float32)

    @pl.when(kk == nk - 1)
    def _epilogue():
        g = acc_ref[...] * inv_denom
        d = g - tgt_ref[...]                       # target tile is already f32
        w = wt_ref[p].astype(jnp.float32)          # 1.0 diagonal, 2.0 off-diagonal
        part = (w * inv_numel) * jnp.sum(d * d)
        # Per-pair lane-dense output block -> pair axis can be "parallel".
        part_ref[...] = jnp.full(part_ref.shape, part, dtype=jnp.float32)


# ----------------------------- wrappers --------------------------------------


def _prep_features(x):
    """Reshape, cast to the MXU feed dtype, zero-pad, and pre-transpose."""
    b, h, w, c = x.shape
    m, k = b * h, w * c
    tm, tk, mp, kp = _tile_plan(m, k, jnp.dtype(_FEED_DTYPE).itemsize)
    feats = x.reshape(m, k).astype(_FEED_DTYPE)
    if (mp, kp) != (m, k):
        feats = jnp.pad(feats, ((0, mp - m), (0, kp - k)))   # zero pad: exact
    feats_t = feats.T          # one-time transpose -> plain (m,k)x(k,n) MXU feed
    return feats, feats_t, m, k, tm, tk, mp, kp


@jax.jit
def gram_matrix_pallas(x):
    """G = (F @ F.T) / (b*h*w*f).  Runs once per module (target construction)."""
    b, h, w, c = x.shape
    feats, feats_t, m, k, tm, tk, mp, kp = _prep_features(x)
    mt, kt = mp // tm, kp // tk
    in_bytes = jnp.dtype(_FEED_DTYPE).itemsize

    kernel = functools.partial(_gram_kernel, inv_denom=1.0 / float(b * h * w * c))
    g = pl.pallas_call(
        kernel,
        out_shape=jax.ShapeDtypeStruct((mp, mp), jnp.float32),
        grid_spec=pltpu.PrefetchScalarGridSpec(
            num_scalar_prefetch=0,
            grid=(mt, mt, kt),
            in_specs=[
                pl.BlockSpec((tm, tk), lambda i, j, kk: (i, kk)),
                pl.BlockSpec((tk, tm), lambda i, j, kk: (kk, j)),
            ],
            out_specs=pl.BlockSpec((tm, tm), lambda i, j, kk: (i, j)),
            scratch_shapes=[pltpu.VMEM((tm, tm), jnp.float32)],
        ),
        compiler_params=pltpu.CompilerParams(
            dimension_semantics=("parallel", "parallel", "arbitrary"),
            vmem_limit_bytes=_VMEM_LIMIT),
        cost_estimate=pl.CostEstimate(
            flops=2 * mp * mp * kp,
            transcendentals=0,
            bytes_accessed=2 * mt * mp * kp * in_bytes + mp * mp * 4),
    )(feats, feats_t)
    return g[:m, :m] if mp != m else g


@jax.jit
def style_loss_forward(x, target_gram):
    """Returns (x unchanged, scalar MSE(gram(x), target_gram))."""
    b, h, w, c = x.shape
    feats, feats_t, m, k, tm, tk, mp, kp = _prep_features(x)
    tgt = target_gram.astype(jnp.float32)
    if mp != m:
        # Zero-padded rows/cols of G match zero-padded target -> diff == 0 there.
        tgt = jnp.pad(tgt, ((0, mp - m), (0, mp - m)))
    mt, kt = mp // tm, kp // tk
    in_bytes = jnp.dtype(_FEED_DTYPE).itemsize

    # Enumerate only upper-triangular tile pairs; mirror via weight 2.
    ti_l, tj_l, wt_l = [], [], []
    for i in range(mt):
        for j in range(i, mt):
            ti_l.append(i)
            tj_l.append(j)
            wt_l.append(1 if i == j else 2)
    npairs = len(ti_l)
    ti_a = jnp.asarray(ti_l, jnp.int32)
    tj_a = jnp.asarray(tj_l, jnp.int32)
    wt_a = jnp.asarray(wt_l, jnp.int32)

    kernel = functools.partial(
        _style_loss_kernel,
        inv_denom=1.0 / float(b * h * w * c),
        inv_numel=1.0 / float(m * m),
    )
    partials = pl.pallas_call(
        kernel,
        out_shape=jax.ShapeDtypeStruct((npairs, 8, 128), jnp.float32),
        grid_spec=pltpu.PrefetchScalarGridSpec(
            num_scalar_prefetch=3,
            grid=(npairs, kt),
            in_specs=[
                # lhs block index is constant across a row of pairs (same ti, kt==1
                # in the common case) -> Pallas skips re-DMA of the lhs strip.
                pl.BlockSpec((tm, tk), lambda p, kk, ti, tj, wt: (ti[p], kk)),
                pl.BlockSpec((tk, tm), lambda p, kk, ti, tj, wt: (kk, tj[p])),
                pl.BlockSpec((tm, tm), lambda p, kk, ti, tj, wt: (ti[p], tj[p])),
            ],
            out_specs=pl.BlockSpec((1, 8, 128),
                                   lambda p, kk, ti, tj, wt: (p, 0, 0)),
            scratch_shapes=[pltpu.VMEM((tm, tm), jnp.float32)],
        ),
        # Per-pair output blocks -> the pair axis is "parallel" (v7x megacore);
        # only the contraction axis revisits the output / accumulator.
        compiler_params=pltpu.CompilerParams(
            dimension_semantics=("parallel", "arbitrary"),
            vmem_limit_bytes=_VMEM_LIMIT),
        cost_estimate=pl.CostEstimate(
            flops=2 * npairs * tm * tm * kp,
            transcendentals=0,
            bytes_accessed=(npairs + mt) * tm * kp * in_bytes
                           + npairs * tm * tm * 4 + npairs * 8 * 128 * 4),
    )(ti_a, tj_a, wt_a, feats, feats_t, tgt)
    loss = jnp.sum(partials[:, 0, 0])
    # forward() returns the input unchanged; the loss is a side result.
    return x, loss


class StyleLoss:
    """JAX/Pallas mirror of the PyTorch StyleLoss module."""

    def __init__(self, target_feature):
        self.target = gram_matrix_pallas(target_feature)   # detached by construction
        self.loss = jnp.float32(0.0)                        # mse(target, target) == 0

    def __call__(self, x):
        # NOTE: self.loss is Python-side state (mirrors the nn.Module); it will
        # capture a tracer under jit/grad — use the functional API there.
        out, self.loss = style_loss_forward(x, self.target)
        return out


# ----------------------------- reference & main -------------------------------


def _gram_ref(t, bf16_inputs):
    """Pure-JAX reference.  bf16_inputs=True matches the kernel's MXU feed."""
    b, h, w, c = t.shape
    f = t.reshape(b * h, w * c)
    if bf16_inputs:
        f = f.astype(jnp.bfloat16).astype(jnp.float32)
    g = jnp.dot(f, f.T, precision=lax.Precision.HIGHEST)
    return g / float(b * h * w * c)


if __name__ == "__main__":
    key = jax.random.PRNGKey(0)
    k_t, k_x = jax.random.split(key)

    # (batch, h, w, f_map_num) — small shapes consistent with the module
    target_feature = jax.random.normal(k_t, (2, 16, 16, 4), dtype=jnp.float32)
    x = jax.random.normal(k_x, (2, 16, 16, 4), dtype=jnp.float32)

    module = StyleLoss(target_feature)
    out = module(x)
    out = jax.block_until_ready(out)
    loss = jax.block_until_ready(module.loss)

    # bf16-consistent reference (kernel feeds the MXU bf16, accumulates f32)
    t_bf = _gram_ref(target_feature, True)
    g_bf = _gram_ref(x, True)
    loss_bf = jnp.mean((g_bf - t_bf) ** 2)

    # pure-f32 reference (sanity; bf16 feed costs a little precision)
    t_f32 = _gram_ref(target_feature, False)
    g_f32 = _gram_ref(x, False)
    loss_f32 = jnp.mean((g_f32 - t_f32) ** 2)

    assert out.shape == x.shape and bool(jnp.all(out == x)), "forward must return input"
    assert jnp.allclose(module.target, t_bf, rtol=1e-5, atol=1e-6), "target gram mismatch"
    assert jnp.allclose(loss, loss_bf, rtol=1e-3, atol=1e-7), (loss, loss_bf)
    assert jnp.allclose(module.target, t_f32, rtol=2e-2, atol=2e-3), "target gram far from f32 ref"
    assert jnp.allclose(loss, loss_f32, rtol=5e-2, atol=1e-6), (loss, loss_f32)

    print("KERNEL_OK")
</pallas_src>

<mosaic_0001>
module attributes {stable_mosaic.version = 11 : i64} {
  func.func @_gram_kernel(%arg0: i32, %arg1: i32, %arg2: i32, %arg3: memref<128x128xbf16, #tpu.memory_space<vmem>>, %arg4: memref<128x128xbf16, #tpu.memory_space<vmem>>, %arg5: memref<128x128xf32, #tpu.memory_space<vmem>>, %arg6: memref<128x128xf32, #tpu.memory_space<vmem>>) attributes {dimension_semantics = [#tpu.dimension_semantics<parallel>, #tpu.dimension_semantics<parallel>, #tpu.dimension_semantics<arbitrary>], iteration_bounds = array<i64: 1, 1, 1>, scalar_prefetch = 0 : i64, scratch_operands = 1 : i64, tpu.core_type = #tpu.core_type<tc>, window_params = [{transform_indices = @transform_0, window_bounds = array<i64: 128, 128>}, {transform_indices = @transform_1, window_bounds = array<i64: 128, 128>}, {transform_indices = @transform_2, window_bounds = array<i64: 128, 128>}]} {
    %c0_i32 = arith.constant 0 : i32
    %0 = arith.cmpi eq, %arg2, %c0_i32 : i32
    %1 = arith.extui %0 : i1 to i32
    %c0_i32_0 = arith.constant 0 : i32
    %2 = arith.cmpi ne, %1, %c0_i32_0 : i32
    scf.if %2 {
      %cst_10 = arith.constant 0.000000e+00 : f32
      %12 = vector.broadcast %cst_10 : f32 to vector<128x128xf32>
      %c0_11 = arith.constant 0 : index
      %c0_12 = arith.constant 0 : index
      %13 = vector.load %arg6[%c0_11, %c0_12] : memref<128x128xf32, #tpu.memory_space<vmem>>, vector<128x128xf32>
      tpu.vector_store %arg6[%c0_11, %c0_12], %12 {strides = array<i32>} : memref<128x128xf32, #tpu.memory_space<vmem>>, vector<128x128xf32>,
    } else {
    }
    %c0 = arith.constant 0 : index
    %c0_1 = arith.constant 0 : index
    %3 = vector.load %arg6[%c0, %c0_1] : memref<128x128xf32, #tpu.memory_space<vmem>>, vector<128x128xf32>
    %c0_2 = arith.constant 0 : index
    %c0_3 = arith.constant 0 : index
    %4 = vector.load %arg3[%c0_2, %c0_3] : memref<128x128xbf16, #tpu.memory_space<vmem>>, vector<128x128xbf16>
    %c0_4 = arith.constant 0 : index
    %c0_5 = arith.constant 0 : index
    %5 = vector.load %arg4[%c0_4, %c0_5] : memref<128x128xbf16, #tpu.memory_space<vmem>>, vector<128x128xbf16>
    %cst = arith.constant dense<0.000000e+00> : vector<128x128xf32>
    %6 = tpu.matmul %4, %5, %cst {dimension_numbers = #tpu.dot_dimension_numbers<[1], [0], [0], [1], [0, 0, 1, 1], [], []>} : vector<128x128xbf16>, vector<128x128xbf16>, vector<128x128xf32> -> vector<128x128xf32>
    %7 = arith.addf %3, %6 : vector<128x128xf32>
    %c0_6 = arith.constant 0 : index
    %c0_7 = arith.constant 0 : index
    %8 = vector.load %arg6[%c0_6, %c0_7] : memref<128x128xf32, #tpu.memory_space<vmem>>, vector<128x128xf32>
    tpu.vector_store %arg6[%c0_6, %c0_7], %7 {strides = array<i32>} : memref<128x128xf32, #tpu.memory_space<vmem>>, vector<128x128xf32>,
    %c0_i32_8 = arith.constant 0 : i32
    %9 = arith.cmpi eq, %arg2, %c0_i32_8 : i32
    %10 = arith.extui %9 : i1 to i32
    %c0_i32_9 = arith.constant 0 : i32
    %11 = arith.cmpi ne, %10, %c0_i32_9 : i32
    scf.if %11 {
      %c0_10 = arith.constant 0 : index
      %c0_11 = arith.constant 0 : index
      %12 = vector.load %arg6[%c0_10, %c0_11] : memref<128x128xf32, #tpu.memory_space<vmem>>, vector<128x128xf32>
      %cst_12 = arith.constant 4.8828125E-4 : f32
      %13 = vector.broadcast %cst_12 : f32 to vector<128x128xf32>
      %14 = arith.mulf %12, %13 : vector<128x128xf32>
      %c0_13 = arith.constant 0 : index
      %c0_14 = arith.constant 0 : index
      %15 = vector.load %arg5[%c0_13, %c0_14] : memref<128x128xf32, #tpu.memory_space<vmem>>, vector<128x128xf32>
      tpu.vector_store %arg5[%c0_13, %c0_14], %14 {strides = array<i32>} : memref<128x128xf32, #tpu.memory_space<vmem>>, vector<128x128xf32>,
    } else {
    }
    return
  }
  func.func @transform_0(%arg0: i32, %arg1: i32, %arg2: i32) -> (i32, i32) {
    %c0_i32 = arith.constant 0 : i32
    return %arg0, %arg2 : i32, i32
  }
  func.func @transform_1(%arg0: i32, %arg1: i32, %arg2: i32) -> (i32, i32) {
    %c0_i32 = arith.constant 0 : i32
    return %arg2, %arg1 : i32, i32
  }
  func.func @transform_2(%arg0: i32, %arg1: i32, %arg2: i32) -> (i32, i32) {
    %c0_i32 = arith.constant 0 : i32
    return %arg0, %arg1 : i32, i32
  }
}

</mosaic_0001>

<bundles_post_ra>
// kernel: gram_matrix_pallas.1
= control target key start
LH: loop header
LB: loop body
LE: loop exit
PB: predicated region body
PF: predicated region fallthrough
CT: control target
= control target key end

     0   :  { %s567_s1 = inlined_call_operand.vmem [shape: bf16[128,128], index: 1, kind: input, shape index: {}]   ;;  %s568_s0 = inlined_call_operand.vmem [shape: bf16[128,128], index: 0, kind: input, shape index: {}]   ;;  %s569_s2 = inlined_call_operand.vmem [shape: f32[128,128], index: 2, kind: output, shape index: {}]  }
   0x1   :  { %v440_v0 = vld [vmem:[%s567_s1] sm:$0xff]   ;;  %v441_v1 = vld [vmem:[%s567_s1 + $0x8] sm:$0xff]   ;;  %v442_v2 = vld [vmem:[%s567_s1 + $0x10] sm:$0xff]  }
   0x2   :  { %392 = vmatprep.subr.bf16.mxu0 %v440_v0  ;;  %424 = vmatprep.subr.bf16.mxu1 %v440_v0  ;;  %v443_v3 = vld [vmem:[%s567_s1 + $0x18] sm:$0xff]   ;;  %v448_v4 = vld [vmem:[%s568_s0] sm:$0xff]   ;;  %v445_v7 = vld [vmem:[%s567_s1 + $0x28] sm:$0xff]  }
   0x3   :  { %393 = vmatpush3.bf16.msra.mxu0 %v440_v0  ;;  %432 = vmatpush3.bf16.msra.mxu1 %v440_v0  ;;  %v449_v5 = vld [vmem:[%s568_s0 + $0x20] sm:$0xff]   ;;  %v446_v8 = vld [vmem:[%s567_s1 + $0x30] sm:$0xff]   ;;  %v447_v9 = vld [vmem:[%s567_s1 + $0x38] sm:$0xff]  }
   0x4   :  { %394 = vmatprep.subr.bf16.mxu0 %v441_v1  ;;  %425 = vmatprep.subr.bf16.mxu1 %v441_v1  ;;  %v444_v6 = vld [vmem:[%s567_s1 + $0x20] sm:$0xff]   ;;  %v450_v10 = vld [vmem:[%s568_s0 + $0x8] sm:$0xff]   ;;  %v452_v12 = vld [vmem:[%s568_s0 + $0x10] sm:$0xff]  }
   0x5   :  { %408 = vmatprep.mubr.bf16.mxu0 %v448_v4  ;;  %416 = vmatprep.mubr.bf16.mxu1 %v449_v5  ;;  %v451_v11 = vld [vmem:[%s568_s0 + $0x28] sm:$0xff]   ;;  %v453_v13 = vld [vmem:[%s568_s0 + $0x30] sm:$0xff]   ;;  %v454_v14 = vld [vmem:[%s568_s0 + $0x18] sm:$0xff]  }
   0x6   :  { %v455_v15 = vld [vmem:[%s568_s0 + $0x38] sm:$0xff]  }
   0x7   :  { %395 = vmatpush3.bf16.msra.mxu0 %v441_v1  ;;  %433 = vmatpush3.bf16.msra.mxu1 %v441_v1 }
   0x8   :  { %396 = vmatprep.subr.bf16.mxu0 %v442_v2  ;;  %426 = vmatprep.subr.bf16.mxu1 %v442_v2 }
   0xb   :  { %397 = vmatpush3.bf16.msra.mxu0 %v442_v2  ;;  %434 = vmatpush3.bf16.msra.mxu1 %v442_v2 }
   0xc   :  { %398 = vmatprep.subr.bf16.mxu0 %v443_v3  ;;  %427 = vmatprep.subr.bf16.mxu1 %v443_v3 }
   0xf   :  { %399 = vmatpush3.bf16.msra.mxu0 %v443_v3  ;;  %435 = vmatpush3.bf16.msra.mxu1 %v443_v3 }
  0x10   :  { %400 = vmatprep.subr.bf16.mxu0 %v444_v6  ;;  %428 = vmatprep.subr.bf16.mxu1 %v444_v6 }
  0x13   :  { %401 = vmatpush3.bf16.msra.mxu0 %v444_v6  ;;  %436 = vmatpush3.bf16.msra.mxu1 %v444_v6 }
  0x14   :  { %402 = vmatprep.subr.bf16.mxu0 %v445_v7  ;;  %429 = vmatprep.subr.bf16.mxu1 %v445_v7 }
  0x17   :  { %403 = vmatpush3.bf16.msra.mxu0 %v445_v7  ;;  %437 = vmatpush3.bf16.msra.mxu1 %v445_v7 }
  0x18   :  { %404 = vmatprep.subr.bf16.mxu0 %v446_v8  ;;  %430 = vmatprep.subr.bf16.mxu1 %v446_v8 }
  0x1b   :  { %405 = vmatpush3.bf16.msra.mxu0 %v446_v8  ;;  %438 = vmatpush3.bf16.msra.mxu1 %v446_v8 }
  0x1c   :  { %406 = vmatprep.subr.bf16.mxu0 %v447_v9  ;;  %431 = vmatprep.subr.bf16.mxu1 %v447_v9 }
  0x1f   :  { %407 = vmatpush3.bf16.msra.mxu0 %v447_v9  ;;  %439 = vmatpush3.bf16.msra.mxu1 %v447_v9 }
  0x22   :  { %409 = vmatmul.mubr.bf16.vlgmr.msra.gmra.mrb[0].mxu0 %v450_v10  ;;  %417 = vmatmul.mubr.bf16.vlgmr.msra.gmra.mrb[0].mxu1 %v451_v11 }
  0x23   :  { %412 = vmatprep.mubr.bf16.mxu0 %v452_v12  ;;  %420 = vmatprep.mubr.bf16.mxu1 %v453_v13 }
  0x2a   :  { %413 = vmatmul.mubr.bf16.gmra.mrb[4].mxu0 %v454_v14  ;;  %421 = vmatmul.mubr.bf16.gmra.mrb[4].mxu1 %v455_v15 }
  0xf5   :  { %v410_v16 = vpop.f32.mrb[0].mxu0  ;;  %v418_v17 = vpop.f32.mrb[0].mxu1 }
  0xf6   :  { %v326_v18 = vmul.f32 0.00048828125, %v410_v16  ;;  %v334_v19 = vmul.f32 0.00048828125, %v418_v17  ;;  %v210_v20 = vpop.f32.mrb[1].mxu0  ;;  %v242_v21 = vpop.f32.mrb[1].mxu1 }
  0xf7   :  { %v324_v22 = vmul.f32 0.00048828125, %v210_v20  ;;  %v332_v23 = vmul.f32 0.00048828125, %v242_v21  ;;  %v411_v24 = vpop.f32.mrb[2].mxu0  ;;  %v419_v25 = vpop.f32.mrb[2].mxu1 }
  0xf8   :  { %342 = vst [vmem:[%s569_s2 + $0x10] sm:$0xff] %v326_v18  ;;  %350 = vst [vmem:[%s569_s2 + $0x50] sm:$0xff] %v334_v19  ;;  %v327_v26 = vmul.f32 0.00048828125, %v411_v24  ;;  %v335_v27 = vmul.f32 0.00048828125, %v419_v25  ;;  %v213_v28 = vpop.f32.mrb[3].mxu0  ;;  %v245_v29 = vpop.f32.mrb[3].mxu1 }
  0xf9   :  { %340 = vst [vmem:[%s569_s2] sm:$0xff] %v324_v22  ;;  %348 = vst [vmem:[%s569_s2 + $0x40] sm:$0xff] %v332_v23  ;;  %v325_v30 = vmul.f32 0.00048828125, %v213_v28  ;;  %v333_v31 = vmul.f32 0.00048828125, %v245_v29 }
  0xfa   :  { %343 = vst [vmem:[%s569_s2 + $0x18] sm:$0xff] %v327_v26  ;;  %351 = vst [vmem:[%s569_s2 + $0x58] sm:$0xff] %v335_v27 }
  0xfb   :  { %341 = vst [vmem:[%s569_s2 + $0x8] sm:$0xff] %v325_v30  ;;  %349 = vst [vmem:[%s569_s2 + $0x48] sm:$0xff] %v333_v31 }
  0xfd   :  { %v414_v32 = vpop.f32.mrb[4].mxu0  ;;  %v422_v33 = vpop.f32.mrb[4].mxu1 }
  0xfe   :  { %v330_v34 = vmul.f32 0.00048828125, %v414_v32  ;;  %v338_v35 = vmul.f32 0.00048828125, %v422_v33  ;;  %v226_v36 = vpop.f32.mrb[5].mxu0  ;;  %v258_v37 = vpop.f32.mrb[5].mxu1 }
  0xff   :  { %v328_v38 = vmul.f32 0.00048828125, %v226_v36  ;;  %v336_v39 = vmul.f32 0.00048828125, %v258_v37  ;;  %v415_v40 = vpop.f32.mrb[6].mxu0  ;;  %v423_v41 = vpop.f32.mrb[6].mxu1 }
 0x100   :  { %346 = vst [vmem:[%s569_s2 + $0x30] sm:$0xff] %v330_v34  ;;  %354 = vst [vmem:[%s569_s2 + $0x70] sm:$0xff] %v338_v35  ;;  %v331_v42 = vmul.f32 0.00048828125, %v415_v40  ;;  %v339_v43 = vmul.f32 0.00048828125, %v423_v41  ;;  %v229_v44 = vpop.f32.mrb[7].mxu0  ;;  %v261_v45 = vpop.f32.mrb[7].mxu1 }
 0x101   :  { %344 = vst [vmem:[%s569_s2 + $0x20] sm:$0xff] %v328_v38  ;;  %352 = vst [vmem:[%s569_s2 + $0x60] sm:$0xff] %v336_v39  ;;  %v329_v46 = vmul.f32 0.00048828125, %v229_v44  ;;  %v337_v47 = vmul.f32 0.00048828125, %v261_v45 }
 0x102   :  { %347 = vst [vmem:[%s569_s2 + $0x38] sm:$0xff] %v331_v42  ;;  %355 = vst [vmem:[%s569_s2 + $0x78] sm:$0xff] %v339_v43 }
 0x103   :  { %345 = vst [vmem:[%s569_s2 + $0x28] sm:$0xff] %v329_v46  ;;  %353 = vst [vmem:[%s569_s2 + $0x68] sm:$0xff] %v337_v47 }

</bundles_post_ra>
